<compile_context>
chip_gen: v6e
topology: v6e:2x2x1
jax: 0.10.0
libtpu: 0.0.40
codegen_flags: <defaults>
</compile_context>

<pallas_src>
import math
import functools

import jax
import jax.numpy as jnp
from jax.experimental import pallas as pl
from jax.experimental.pallas import tpu as pltpu


def _round_up(x: int, m: int) -> int:
    return ((x + m - 1) // m) * m


def _freq_enc_kernel(x_ref, freq_ref, o_ref, *, in_dim, num_freq, include_input):
    """Hot path for one [TN, in_dim] tile.

    x_ref:    [TN, in_dim]        input tile (any float dtype)
    freq_ref: [1, num_freq]       2**linspace(min, max, F), float32
    o_ref:    [TN, out_dim]       out_dim = 2*in_dim*num_freq (+ in_dim)
    """
    df = in_dim * num_freq
    x = x_ref[...]                                   # [TN, D]
    xf = x.astype(jnp.float32)                       # compute in f32
    scaled = jnp.float32(2.0 * math.pi) * xf         # [TN, D]
    freqs = freq_ref[...]                            # [1, F] f32

    # d-major (D, F) products built along the lane axis (matches
    # (scaled[..., None] * freqs).reshape(..., D*F) in the PyTorch reference).
    pieces = [scaled[:, d:d + 1] * freqs for d in range(in_dim)]
    prod = jnp.concatenate(pieces, axis=-1) if in_dim > 1 else pieces[0]  # [TN, D*F]

    # Single sin over [sin-args | cos-args] -> one EUP pass, then one slice store.
    both = jnp.concatenate(
        [prod, prod + jnp.float32(math.pi / 2.0)], axis=-1)   # [TN, 2*D*F]
    o_ref[:, : 2 * df] = jnp.sin(both).astype(o_ref.dtype)

    if include_input:
        o_ref[:, 2 * df:] = x.astype(o_ref.dtype)


def frequency_encoding(
    in_tensor: jax.Array,
    num_frequencies: int,
    min_freq_exp: float,
    max_freq_exp: float,
    include_input: bool = True,
    tile_rows: int = 16384,
) -> jax.Array:
    """JAX/Pallas equivalent of FrequancyEncoding.pytorch_fwd."""
    orig_shape = in_tensor.shape
    in_dim = orig_shape[-1]
    n_rows = int(math.prod(orig_shape[:-1])) if len(orig_shape) > 1 else 1
    out_dim = in_dim * num_frequencies * 2 + (in_dim if include_input else 0)

    itemsize = jnp.dtype(in_tensor.dtype).itemsize
    sublane = {4: 8, 2: 16, 1: 32}.get(itemsize, 8)

    # VMEM-aware row tile: keep each (double-buffered) output tile <= ~4 MiB so the
    # kernel plus f32 intermediates stays comfortably inside the scoped VMEM limit,
    # round to the sublane granule, and clamp so tiny inputs don't allocate a huge,
    # mostly-masked block.  Ragged tails are handled by the cdiv grid.
    out_tile_budget = 4 * 1024 * 1024
    rows_cap = max(sublane, out_tile_budget // max(1, out_dim * 4))
    tile_rows = min(int(tile_rows), rows_cap)
    tile_rows = _round_up(max(tile_rows, sublane), sublane)
    tile_rows = min(tile_rows, _round_up(n_rows, sublane))

    x2d = in_tensor.reshape(n_rows, in_dim)

    # freqs = 2 ** linspace(min, max, F)  (kept exact, f32, tiny resident input)
    freqs = (2.0 ** jnp.linspace(min_freq_exp, max_freq_exp, num_frequencies)
             ).astype(jnp.float32).reshape(1, num_frequencies)

    kernel = functools.partial(
        _freq_enc_kernel,
        in_dim=in_dim,
        num_freq=num_frequencies,
        include_input=include_input,
    )

    cost = pl.CostEstimate(
        flops=n_rows * (in_dim + 3 * in_dim * num_frequencies),
        transcendentals=2 * n_rows * in_dim * num_frequencies,
        bytes_accessed=n_rows * (in_dim + out_dim) * itemsize
        + num_frequencies * 4,
    )

    out2d = pl.pallas_call(
        kernel,
        out_shape=jax.ShapeDtypeStruct((n_rows, out_dim), in_tensor.dtype),
        grid_spec=pltpu.PrefetchScalarGridSpec(
            num_scalar_prefetch=0,
            grid=(pl.cdiv(n_rows, tile_rows),),
            in_specs=[
                pl.BlockSpec((tile_rows, in_dim), lambda i: (i, 0)),
                pl.BlockSpec((1, num_frequencies), lambda i: (0, 0)),
            ],
            out_specs=pl.BlockSpec((tile_rows, out_dim), lambda i: (i, 0)),
        ),
        compiler_params=pltpu.CompilerParams(
            dimension_semantics=("parallel",),
            vmem_limit_bytes=32 * 1024 * 1024,
        ),
        cost_estimate=cost,
    )(x2d, freqs)

    return out2d.reshape(*orig_shape[:-1], out_dim)


def _reference(in_tensor, num_frequencies, min_freq_exp, max_freq_exp, include_input=True):
    """Pure-JAX reference mirroring the PyTorch code exactly."""
    scaled = 2.0 * math.pi * in_tensor
    freqs = 2.0 ** jnp.linspace(min_freq_exp, max_freq_exp, num_frequencies)
    scaled_inputs = scaled[..., None] * freqs
    scaled_inputs = scaled_inputs.reshape(*scaled_inputs.shape[:-2], -1)
    enc = jnp.sin(jnp.concatenate([scaled_inputs, scaled_inputs + math.pi / 2.0], axis=-1))
    if include_input:
        enc = jnp.concatenate([enc, in_tensor], axis=-1)
    return enc


if __name__ == "__main__":
    # Module config (deterministic, synthetic): in_dim=3, 6 frequencies, exps 0..5
    in_dim = 3
    num_frequencies = 6
    min_freq_exp = 0.0
    max_freq_exp = 5.0
    include_input = True
    out_dim = in_dim * num_frequencies * 2 + in_dim

    key = jax.random.PRNGKey(0)

    # Test 1: small standard shape [batch=2, seq=16, in_dim=3] (single block).
    x = jax.random.normal(key, (2, 16, in_dim), dtype=jnp.float32)
    out = frequency_encoding(x, num_frequencies, min_freq_exp, max_freq_exp,
                             include_input=include_input)
    out = jax.block_until_ready(out)
    ref = _reference(x, num_frequencies, min_freq_exp, max_freq_exp, include_input)
    assert out.shape == ref.shape == (2, 16, out_dim)
    assert jnp.allclose(out, ref, atol=1e-5, rtol=1e-5), "mismatch vs reference (test 1)"

    # Test 2: ragged row count (300 rows, tile 256) exercises the cdiv grid +
    # masked tail (no divisibility assert).
    x2 = jax.random.normal(jax.random.PRNGKey(1), (3, 100, in_dim), dtype=jnp.float32)
    out2 = frequency_encoding(x2, num_frequencies, min_freq_exp, max_freq_exp,
                              include_input=include_input, tile_rows=256)
    out2 = jax.block_until_ready(out2)
    ref2 = _reference(x2, num_frequencies, min_freq_exp, max_freq_exp, include_input)
    assert out2.shape == ref2.shape == (3, 100, out_dim)
    assert jnp.allclose(out2, ref2, atol=1e-5, rtol=1e-5), "mismatch vs reference (test 2)"

    # Test 3: bf16 input + default (large, auto-clamped) tile + include_input=False.
    x3 = jax.random.normal(jax.random.PRNGKey(2), (4, 64, in_dim), dtype=jnp.bfloat16)
    out3 = frequency_encoding(x3, num_frequencies, min_freq_exp, max_freq_exp,
                              include_input=False)
    out3 = jax.block_until_ready(out3)
    ref3 = _reference(x3.astype(jnp.float32), num_frequencies, min_freq_exp,
                      max_freq_exp, include_input=False)
    assert out3.shape == (4, 64, in_dim * num_frequencies * 2)
    assert jnp.allclose(out3.astype(jnp.float32), ref3, atol=2e-2, rtol=2e-2), \
        "mismatch vs reference (test 3)"

    print("KERNEL_OK")
</pallas_src>

<mosaic_0001>
module attributes {stable_mosaic.version = 11 : i64} {
  func.func @_freq_enc_kernel(%arg0: i32, %arg1: memref<32x3xf32, #tpu.memory_space<vmem>>, %arg2: memref<1x6xf32, #tpu.memory_space<vmem>>, %arg3: memref<32x39xf32, #tpu.memory_space<vmem>>) attributes {dimension_semantics = [#tpu.dimension_semantics<parallel>], iteration_bounds = array<i64: 1>, scalar_prefetch = 0 : i64, scratch_operands = 0 : i64, tpu.core_type = #tpu.core_type<tc>, window_params = [{transform_indices = @transform_0, window_bounds = array<i64: 32, 3>}, {pipeline_mode = #tpu.pipeline_mode<synchronous>, transform_indices = @transform_1, window_bounds = array<i64: 1, 6>}, {transform_indices = @transform_2, window_bounds = array<i64: 32, 39>}]} {
    %c0 = arith.constant 0 : index
    %c0_0 = arith.constant 0 : index
    %0 = vector.load %arg1[%c0, %c0_0] : memref<32x3xf32, #tpu.memory_space<vmem>>, vector<32x3xf32>
    %cst = arith.constant 6.28318548 : f32
    %1 = vector.broadcast %cst : f32 to vector<32x3xf32>
    %2 = arith.mulf %1, %0 : vector<32x3xf32>
    %c0_1 = arith.constant 0 : index
    %c0_2 = arith.constant 0 : index
    %3 = vector.load %arg2[%c0_1, %c0_2] : memref<1x6xf32, #tpu.memory_space<vmem>>, vector<1x6xf32>
    %4 = vector.extract_strided_slice %2 {offsets = [0, 0], sizes = [32, 1], strides = [1, 1]} : vector<32x3xf32> to vector<32x1xf32>
    %5 = vector.broadcast %4 : vector<32x1xf32> to vector<32x6xf32>
    %6 = vector.broadcast %3 : vector<1x6xf32> to vector<32x6xf32>
    %7 = arith.mulf %5, %6 : vector<32x6xf32>
    %8 = vector.extract_strided_slice %2 {offsets = [0, 1], sizes = [32, 1], strides = [1, 1]} : vector<32x3xf32> to vector<32x1xf32>
    %9 = vector.broadcast %8 : vector<32x1xf32> to vector<32x6xf32>
    %10 = vector.broadcast %3 : vector<1x6xf32> to vector<32x6xf32>
    %11 = arith.mulf %9, %10 : vector<32x6xf32>
    %12 = vector.extract_strided_slice %2 {offsets = [0, 2], sizes = [32, 1], strides = [1, 1]} : vector<32x3xf32> to vector<32x1xf32>
    %13 = vector.broadcast %12 : vector<32x1xf32> to vector<32x6xf32>
    %14 = vector.broadcast %3 : vector<1x6xf32> to vector<32x6xf32>
    %15 = arith.mulf %13, %14 : vector<32x6xf32>
    %16 = tpu.concatenate %7, %11, %15 in 1 : vector<32x6xf32>, vector<32x6xf32>, vector<32x6xf32> -> vector<32x18xf32>
    %cst_3 = arith.constant 1.57079637 : f32
    %17 = vector.broadcast %cst_3 : f32 to vector<32x18xf32>
    %18 = arith.addf %16, %17 : vector<32x18xf32>
    %19 = tpu.concatenate %16, %18 in 1 : vector<32x18xf32>, vector<32x18xf32> -> vector<32x36xf32>
    %20 = math.sin %19 : vector<32x36xf32>
    %c0_4 = arith.constant 0 : index
    %c0_5 = arith.constant 0 : index
    %21 = vector.load %arg3[%c0_4, %c0_5] : memref<32x39xf32, #tpu.memory_space<vmem>>, vector<32x36xf32>
    tpu.vector_store %arg3[%c0_4, %c0_5], %20 {strides = array<i32>} : memref<32x39xf32, #tpu.memory_space<vmem>>, vector<32x36xf32>,
    %c0_6 = arith.constant 0 : index
    %c36 = arith.constant 36 : index
    %22 = vector.load %arg3[%c0_6, %c36] : memref<32x39xf32, #tpu.memory_space<vmem>>, vector<32x3xf32>
    tpu.vector_store %arg3[%c0_6, %c36], %0 {strides = array<i32>} : memref<32x39xf32, #tpu.memory_space<vmem>>, vector<32x3xf32>,
    return
  }
  func.func @transform_0(%arg0: i32) -> (i32, i32) {
    %c0_i32 = arith.constant 0 : i32
    %c0_i32_0 = arith.constant 0 : i32
    return %arg0, %c0_i32 : i32, i32
  }
  func.func @transform_1(%arg0: i32) -> (i32, i32) {
    %c0_i32 = arith.constant 0 : i32
    %c0_i32_0 = arith.constant 0 : i32
    %c0_i32_1 = arith.constant 0 : i32
    return %c0_i32, %c0_i32_0 : i32, i32
  }
  func.func @transform_2(%arg0: i32) -> (i32, i32) {
    %c0_i32 = arith.constant 0 : i32
    %c0_i32_0 = arith.constant 0 : i32
    return %arg0, %c0_i32 : i32, i32
  }
}

</mosaic_0001>

<bundles_post_ra>
// kernel: tpu_custom_call.1
= control target key start
LH: loop header
LB: loop body
LE: loop exit
PB: predicated region body
PF: predicated region fallthrough
CT: control target
= control target key end

     0   :  { %v710_v3 = vmov 1   ;;  %s1069_s0 = inlined_call_operand.vmem [shape: f32[32,3], index: 0, kind: input, shape index: {}]   ;;  %s1070_s1 = inlined_call_operand.vmem [shape: f32[1,6], index: 1, kind: input, shape index: {}]   ;;  %s1071_s2 = inlined_call_operand.hbm [shape: f32[32,39], index: 2, kind: output, shape index: {}]  }
   0x1   :  { %v744_v0 = vld [vmem:[%s1069_s0 + $0x10] sm:$0xff]  ;;  %v749_v1 = vld [vmem:[%s1069_s0] sm:$0xff]  ;;  %v754_v2 = vld [vmem:[%s1069_s0 + $0x18] sm:$0xff]  ;;  %666 = vset.pattern.permute.xlu1 %v710_v3  ;;  %665 = vset.pattern.permute.xlu0 %v710_v3 }
   0x2   :  { %v18_v4 = vmul.f32 6.2831855, %v744_v0  ;;  %v16_v5 = vmul.f32 6.2831855, %v749_v1  ;;  %v761_v6 = vld [vmem:[%s1069_s0 + $0x8] sm:$0xff] }
   0x3   :  { %7 = vsyncpa [#allocation3], 0  ;;  %v19_v7 = vmul.f32 6.2831855, %v754_v2  ;;  %v17_v8 = vmul.f32 6.2831855, %v761_v6 }
   0x4   :  { %60 = vperm.xlu1 %666, %v18_v4   ;;  %52 = vperm.xlu0 %665, %v16_v5   ;;  %v711_v9 = vmov 2   ;;  %v712_v10 = vmov 0   ;;  %v616_v11 = vld [vmem:[%s1070_s1] ss:$0 sm:$0xff]  ;;  %s713_s18 = smov 6   ;;  %s714_s19 = smov 12  }
   0x5   :  { %vm123_vm0 = vcmask 48128   ;;  %vm128_vm1 = vcmask 97280   ;;  %s715_s1 = smov 18   ;;  %s716_s20 = smov 36   ;;  %vm153_vm2 = vcmask 146432  }
   0x6   :  { %s723_s21 = smov [#allocation2]  }
   0x7   :  { %s605_s22 = sshll.u32 %s723_s21, 4  ;;  %s606_s22 = int_to_ptr.vmem [resolvable:$true] %s605_s22 }
   0x8   :  { %64 = vperm.xlu1 %666, %v19_v7   ;;  %56 = vperm.xlu0 %665, %v17_v8   ;;  %s688_s23 = scalar_lea.vmem %s606_s22, 512  ;;  %p693_p1 = scmp.lt.s32.totalorder %s606_s22, %s606_s22 }
   0x9   :  { %p689_p0 = scmp.ne.s32.totalorder %s606_s22, %s688_s23  ;;  %p694_p2 = scmp.lt.s32.totalorder %s688_s23, %s688_s23 }
   0xb   :  { %p695_p3 = por %p694_p2, %p693_p1 }
   0xc   :  { %668 = vset.pattern.permute.xlu1 %v711_v9  ;;  %667 = vset.pattern.permute.xlu0 %v711_v9 }
   0xd   :  { %76 = vperm.xlu1 %668, %v17_v8   ;;  %72 = vperm.xlu0 %667, %v16_v5   ;;  %p696_p4 = pnand %p695_p3, %p689_p0 }
  0x11   :  { %80 = vperm.xlu1 %668, %v18_v4   ;;  %84 = vperm.xlu0 %667, %v19_v7  }
  0x15   :  { %669 = vset.pattern.permute.xlu1 %v712_v10  ;;  %670 = vset.pattern.permute.xlu0 %v712_v10 }
  0x16   :  { %23 = vperm.xlu1 %669, %v16_v5   ;;  %28 = vperm.xlu0 %670, %v17_v8  }
  0x1a   :  { %33 = vperm.xlu1 %669, %v18_v4   ;;  %671 = vset.pattern.permute.xlu0 %v711_v9 }
  0x1e   :  { %38 = vperm.xlu1 %669, %v19_v7  }
  0x7f   :  { %v61_v12 = vpop.permute.xlu1 %60  ;;  %v53_v13 = vpop.permute.xlu0 %52 }
  0x80   :  { %v67_v14 = vmul.f32 %v616_v11, %v53_v13  ;;  %v69_v15 = vmul.f32 %v616_v11, %v61_v12 }
  0x82   :  { %95 = vrot.lane.b32.xlu0 %v67_v14, %s713_s18 }
  0x83   :  { %v65_v16 = vpop.permute.xlu1 %64  ;;  %v57_v17 = vpop.permute.xlu0 %56 }
  0x84   :  { %v68_v18 = vmul.f32 %v616_v11, %v57_v17  ;;  %v70_v19 = vmul.f32 %v616_v11, %v65_v16 }
  0x86   :  { %99 = vrot.lane.b32.xlu0 %v69_v15, %s713_s18  ;;  %97 = vrot.lane.b32.xlu1 %v68_v18, %s713_s18 }
  0x88   :  { %v77_v20 = vpop.permute.xlu1 %76  ;;  %v73_v21 = vpop.permute.xlu0 %72 }
  0x89   :  { %v87_v22 = vmul.f32 %v616_v11, %v73_v21  ;;  %v88_v23 = vmul.f32 %v616_v11, %v77_v20 }
  0x8a   :  { %101 = vrot.lane.b32.xlu1 %v70_v19, %s713_s18 }
  0x8b   :  { %111 = vrot.lane.b32.xlu0 %v87_v22, %s714_s19 }
  0x8c   :  { %v81_v24 = vpop.permute.xlu1 %80  ;;  %v85_v26 = vpop.permute.xlu0 %84 }
  0x8d   :  { %v89_v25 = vmul.f32 %v616_v11, %v81_v24  ;;  %v90_v27 = vmul.f32 %v616_v11, %v85_v26 }
  0x8e   :  { %113 = vrot.lane.b32.xlu1 %v88_v23, %s714_s19  ;;  %v717_v23 = vmov 683565275  }
  0x8f   :  { %115 = vrot.lane.b32.xlu0 %v89_v25, %s714_s19  ;;  %v718_v25 = vmov 2475754826  }
  0x91   :  { %v24_v28 = vpop.permute.xlu1 %23  ;;  %v29_v30 = vpop.permute.xlu0 %28 }
  0x92   :  { %117 = vrot.lane.b32.xlu1 %v90_v27, %s714_s19  ;;  %v47_v35 = vmul.f32 %v616_v11, %v24_v28  ;;  %v48_v39 = vmul.f32 %v616_v11, %v29_v30  ;;  %v719_v27 = vmov 2131351028  }
  0x95   :  { %v34_v29 = vpop.permute.xlu1 %33 }
  0x96   :  { %v49_v41 = vmul.f32 %v616_v11, %v34_v29  ;;  %v720_v29 = vmov 2102212464  }
  0x99   :  { %v39_v31 = vpop.permute.xlu1 %38 }
  0x9a   :  { %v50_v48 = vmul.f32 %v616_v11, %v39_v31  ;;  %v721_v31 = vmov 920167782  }
  0xf4   :  { %v96_v32 = vpop.permute.xlu0 %95 }
  0xf5   :  { %v124_v37 = vsel %vm123_vm0, %v47_v35, %v96_v32 }
  0xf8   :  { %v98_v33 = vpop.permute.xlu1 %97  ;;  %v100_v34 = vpop.permute.xlu0 %99 }
  0xf9   :  { %v125_v43 = vsel %vm123_vm0, %v48_v39, %v98_v33  ;;  %v126_v45 = vsel %vm123_vm0, %v49_v41, %v100_v34 }
  0xfc   :  { %v102_v36 = vpop.permute.xlu1 %101 }
  0xfd   :  { %v112_v38 = vpop.permute.xlu0 %111  ;;  %v127_v52 = vsel %vm123_vm0, %v50_v48, %v102_v36 }
  0xfe   :  { %v129_v40 = vsel %vm128_vm1, %v124_v37, %v112_v38  ;;  %v722_v38 = vmov 1326507024  }
  0xff   :  { %v133_v42 = vadd.f32 1.5707964, %v129_v40 }
 0x100   :  { %v114_v44 = vpop.permute.xlu1 %113 }
 0x101   :  { %v130_v46 = vsel %vm128_vm1, %v125_v43, %v114_v44  ;;  %141 = vrot.lane.b32.xlu0 %v133_v42, %s715_s1  ;;  %v116_v47 = vpop.permute.xlu0 %115 }
 0x102   :  { %v134_v49 = vadd.f32 1.5707964, %v130_v46  ;;  %v131_v50 = vsel %vm128_vm1, %v126_v45, %v116_v47 }
 0x103   :  { %v135_v51 = vadd.f32 1.5707964, %v131_v50 }
 0x104   :  { %v118_v53 = vpop.permute.xlu1 %117  ;;  %143 = vrot.lane.b32.xlu1 %v134_v49, %s715_s1 }
 0x105   :  { %v776_v54 = vsel %vm128_vm1, %v127_v52, %v118_v53  ;;  %145 = vrot.lane.b32.xlu0 %v135_v51, %s715_s1 }
 0x106   :  { %v136_v55 = vadd.f32 1.5707964, %v776_v54 }
 0x108   :  { %147 = vrot.lane.b32.xlu1 %v136_v55, %s715_s1 }
 0x109   :  { %583 = vrot.lane.b32.xlu0 %v749_v1, %s716_s20 }
 0x10c   :  { %585 = vrot.lane.b32.xlu1 %v761_v6, %s716_s20 }
 0x10d   :  { %587 = vrot.lane.b32.xlu0 %v744_v0, %s716_s20 }
 0x110   :  { %589 = vrot.lane.b32.xlu1 %v754_v2, %s716_s20 }
 0x173   :  { %v142_v56 = vpop.permute.xlu0 %141 }
 0x174   :  { %v784_v57 = vsel %vm153_vm2, %v129_v40, %v142_v56 }
 0x175   :  { %v158_v58 = vand.u32 2147483647, %v784_v57  ;;  %v161_v59 = vand.u32 2139095040, %v784_v57  ;;  %vm160_vm0 = vcmp.lt.s32.totalorder %v784_v57, 0 }
 0x176   :  { %v144_v60 = vpop.permute.xlu1 %143 }
 0x177   :  { %v162_v61 = vshrl.u32 %v161_v59, 23  ;;  %v165_v62 = vand.u32 8388607, %v158_v58  ;;  %v791_v63 = vsel %vm153_vm2, %v130_v46, %v144_v60  ;;  %v146_v0 = vpop.permute.xlu0 %145  ;;  %vm875_vm15 = vcmp.le.f32.partialorder %v158_v58, 0.7853982 }
 0x178   :  { %v262_v1 = vand.u32 2147483647, %v791_v63  ;;  %v265_v2 = vand.u32 2139095040, %v791_v63  ;;  %v796_v3 = vsel %vm153_vm2, %v131_v50, %v146_v0 }
 0x179   :  { %v617_v4 = vadd.s32 4294967169, %v162_v61  ;;  %v369_v7 = vand.u32 2139095040, %v796_v3  ;;  %v166_v8 = vor.u32 8388608, %v165_v62  ;;  %v366_v12 = vand.u32 2147483647, %v796_v3 }
 0x17a   :  { %v266_v5 = vshrl.u32 %v265_v2, 23  ;;  %v269_v6 = vand.u32 8388607, %v262_v1 }
 0x17b   :  { %v168_v9 = vadd.s32 1, %v617_v4  ;;  %v370_v13 = vshrl.u32 %v369_v7, 23  ;;  %v802_v18 = vshll.u32 %v166_v8, 8  ;;  %v808_v21 = vand.u32 8388607, %v366_v12 }
 0x17c   :  { %v621_v10 = vadd.s32 4294967169, %v266_v5  ;;  %v270_v11 = vor.u32 8388608, %v269_v6 }
 0x17d   :  { %vm169_vm3 = vcmp.gt.s32.totalorder %v168_v9, 0  ;;  %v625_v20 = vadd.s32 4294967169, %v370_v13 }
 0x17e   :  { %v170_v14 = vsel %vm169_vm3, %v168_v9, 0  ;;  %v272_v15 = vadd.s32 1, %v621_v10  ;;  %v804_v19 = vshll.u32 %v270_v11, 8 }
 0x17f   :  { %v171_v16 = vshrl.u32 %v170_v14, 5  ;;  %v172_v17 = vand.u32 31, %v170_v14  ;;  %v376_v61 = vadd.s32 1, %v625_v20 }
 0x180   :  { %vm273_vm4 = vcmp.gt.s32.totalorder %v272_v15, 0 }
 0x181   :  { %v173_v22 = vsub.s32 32, %v172_v17  ;;  %v175_v24 = vshll.u32 %v717_v23, %v172_v17  ;;  %v178_v26 = vshll.u32 %v718_v25, %v172_v17  ;;  %v181_v28 = vshll.u32 %v719_v27, %v172_v17 }
 0x182   :  { %v184_v30 = vshll.u32 %v720_v29, %v172_v17  ;;  %v187_v32 = vshll.u32 %v721_v31, %v172_v17  ;;  %vm190_vm5 = vcmp.lt.s32.totalorder %v171_v16, 1  ;;  %vm191_vm6 = vcmp.lt.s32.totalorder %v171_v16, 2 }
 0x183   :  { %v176_v33 = vshrl.u32 %v718_v25, %v173_v22  ;;  %v179_v34 = vshrl.u32 %v719_v27, %v173_v22  ;;  %v182_v35 = vshrl.u32 %v720_v29, %v173_v22  ;;  %v174_v36 = vshrl.u32 %v717_v23, %v173_v22 }
 0x184   :  { %v185_v37 = vshrl.u32 %v721_v31, %v173_v22  ;;  %v188_v39 = vshrl.u32 %v722_v38, %v173_v22  ;;  %vm192_vm7 = vcmp.lt.s32.totalorder %v171_v16, 3  ;;  %v274_v43 = vsel %vm273_vm4, %v272_v15, 0 }
 0x185   :  { %v177_v40 = vor.u32 %v176_v33, %v175_v24  ;;  %v180_v41 = vor.u32 %v179_v34, %v178_v26  ;;  %v183_v42 = vor.u32 %v182_v35, %v181_v28  ;;  %vm193_vm8 = vcmp.lt.s32.totalorder %v171_v16, 4 }
 0x186   :  { %v186_v44 = vor.u32 %v185_v37, %v184_v30  ;;  %v189_v45 = vor.u32 %v188_v39, %v187_v32  ;;  %v276_v46 = vand.u32 31, %v274_v43  ;;  %v275_v2 = vshrl.u32 %v274_v43, 5 }
 0x187   :  { %v194_v47 = vsel %vm190_vm5, %v174_v36, %v177_v40  ;;  %v195_v48 = vsel %vm193_vm8, %v183_v42, 2102212464  ;;  %v198_v49 = vsel %vm190_vm5, %v177_v40, %v180_v41  ;;  %v202_v50 = vsel %vm190_vm5, %v180_v41, %v183_v42 }
 0x188   :  { %v196_v51 = vsel %vm192_vm7, %v180_v41, %v195_v48  ;;  %v199_v52 = vsel %vm193_vm8, %v186_v44, 920167782  ;;  %v203_v53 = vsel %vm193_vm8, %v189_v45, 1326507024  ;;  %v277_v55 = vsub.s32 32, %v276_v46 }
 0x189   :  { %v197_v56 = vsel %vm191_vm6, %v194_v47, %v196_v51  ;;  %v200_v59 = vsel %vm192_vm7, %v183_v42, %v199_v52  ;;  %v204_v60 = vsel %vm192_vm7, %v186_v44, %v203_v53  ;;  %v279_v4 = vshll.u32 %v717_v23, %v276_v46  ;;  %v148_v51 = vpop.permute.xlu1 %147 }
 0x18a   :  { %v201_v62 = vsel %vm191_vm6, %v198_v49, %v200_v59  ;;  %v205_v0 = vsel %vm191_vm6, %v202_v50, %v204_v60  ;;  %v213_v9 = vmul.u32 %v802_v18, %v197_v56  ;;  %v280_v10 = vshrl.u32 %v718_v25, %v277_v55 }
 0x18b   :  { %v833_v5 = vmul.u32.u64.low %v802_v18, %v205_v0  ;;  %v834_v6 = vmul.u32.u64.high %v802_v18, %v205_v0, %v833_v5  ;;  %v837_v7 = vmul.u32.u64.low %v802_v18, %v201_v62  ;;  %v838_v8 = vmul.u32.u64.high %v802_v18, %v201_v62, %v837_v7 }
 0x18c   :  { %v282_v11 = vshll.u32 %v718_v25, %v276_v46  ;;  %v283_v13 = vshrl.u32 %v719_v27, %v277_v55  ;;  %v285_v14 = vshll.u32 %v719_v27, %v276_v46  ;;  %v286_v15 = vshrl.u32 %v720_v29, %v277_v55 }
 0x18d   :  { %v288_v16 = vshll.u32 %v720_v29, %v276_v46  ;;  %v289_v17 = vshrl.u32 %v721_v31, %v277_v55  ;;  %v281_v20 = vor.u32 %v280_v10, %v279_v4  ;;  %v291_v24 = vshll.u32 %v721_v31, %v276_v46 }
 0x18e   :  { %v284_v22 = vor.u32 %v283_v13, %v282_v11  ;;  %v292_v18 = vshrl.u32 %v722_v38, %v277_v55  ;;  %vm215_vm9 = vc.u32 %v834_v6, %v837_v7  ;;  %v216_v26 = vadd.s32 1, %v838_v8 }
 0x18f   :  { %v278_v28 = vshrl.u32 %v717_v23, %v277_v55  ;;  %v287_v30 = vor.u32 %v286_v15, %v285_v14  ;;  %v290_v32 = vor.u32 %v289_v17, %v288_v16  ;;  %vm294_vm10 = vcmp.lt.s32.totalorder %v275_v2, 1 }
 0x190   :  { %v293_v33 = vor.u32 %v292_v18, %v291_v24  ;;  %vm295_vm11 = vcmp.lt.s32.totalorder %v275_v2, 2  ;;  %v217_v34 = vsel %vm215_vm9, %v216_v26, %v838_v8  ;;  %vm296_vm12 = vcmp.lt.s32.totalorder %v275_v2, 3 }
 0x191   :  { %vm297_vm13 = vcmp.lt.s32.totalorder %v275_v2, 4  ;;  %v302_v35 = vsel %vm294_vm10, %v281_v20, %v284_v22  ;;  %v218_v36 = vadd.s32 %v217_v34, %v213_v9  ;;  %v306_v40 = vsel %vm294_vm10, %v284_v22, %v287_v30 }
 0x192   :  { %v299_v37 = vsel %vm297_vm13, %v287_v30, 2102212464  ;;  %v303_v39 = vsel %vm297_vm13, %v290_v32, 920167782  ;;  %v298_v41 = vsel %vm294_vm10, %v278_v28, %v281_v20  ;;  %v307_v43 = vsel %vm297_vm13, %v293_v33, 1326507024 }
 0x193   :  { %v304_v42 = vsel %vm296_vm12, %v287_v30, %v303_v39  ;;  %vm377_vm14 = vcmp.gt.s32.totalorder %v376_v61, 0  ;;  %v219_v44 = vadd.s32 536870912, %v218_v36  ;;  %v300_v45 = vsel %vm296_vm12, %v284_v22, %v299_v37 }
 0x194   :  { %v305_v46 = vsel %vm295_vm11, %v302_v35, %v304_v42  ;;  %v308_v47 = vsel %vm296_vm12, %v290_v32, %v307_v43  ;;  %v378_v56 = vsel %vm377_vm14, %v376_v61, 0  ;;  %v301_v59 = vsel %vm295_vm11, %v298_v41, %v300_v45 }
 0x195   :  { %v309_v48 = vsel %vm295_vm11, %v306_v40, %v308_v47  ;;  %v859_v49 = vmul.u32.u64.low %v804_v19, %v305_v46  ;;  %v860_v50 = vmul.u32.u64.high %v804_v19, %v305_v46, %v859_v49  ;;  %v220_v52 = vshrl.u32 %v219_v44, 30 }
 0x196   :  { %v864_v53 = vmul.u32.u64.low %v804_v19, %v309_v48  ;;  %v865_v55 = vmul.u32.u64.high %v804_v19, %v309_v48, %v864_v53  ;;  %v374_v60 = vor.u32 8388608, %v808_v21  ;;  %v380_v62 = vand.u32 31, %v378_v56 }
 0x197   :  { %v221_v0 = vshll.u32 %v220_v52, 30  ;;  %v871_v4 = vsel %vm153_vm2, %v776_v54, %v148_v51  ;;  %v320_v61 = vadd.s32 1, %v860_v50  ;;  %v244_v21 = vsub.s32 4, %v220_v52 }
 0x198   :  { %v381_v2 = vsub.s32 32, %v380_v62  ;;  %v317_v9 = vmul.u32 %v804_v19, %v301_v59  ;;  %vm319_vm1 = vc.u32 %v865_v55, %v859_v49  ;;  %v887_v10 = vshll.u32 %v374_v60, 8 }
 0x199   :  { %v881_v8 = vsub.s32 %v218_v36, %v221_v0  ;;  %v321_v54 = vsel %vm319_vm1, %v320_v61, %v860_v50  ;;  %v470_v58 = vand.u32 2147483647, %v871_v4  ;;  %v473_v11 = vand.u32 2139095040, %v871_v4 }
 0x19a   :  { %v322_v14 = vadd.s32 %v321_v54, %v317_v9  ;;  %v384_v15 = vshrl.u32 %v718_v25, %v381_v2  ;;  %v387_v16 = vshrl.u32 %v719_v27, %v381_v2  ;;  %v214_v19 = vadd.s32 %v837_v7, %v834_v6 }
 0x19b   :  { %v224_v13 = vsub.s32 0, %v881_v8  ;;  %v896_v17 = vshrl.u32 %v378_v56, 5  ;;  %v383_v20 = vshll.u32 %v717_v23, %v380_v62  ;;  %v390_v22 = vshrl.u32 %v720_v29, %v381_v2 }
 0x19c   :  { %v245_v18 = vsel %vm160_vm0, %v244_v21, %v220_v52  ;;  %v323_v26 = vadd.s32 536870912, %v322_v14  ;;  %v386_v28 = vshll.u32 %v718_v25, %v380_v62  ;;  %v389_v30 = vshll.u32 %v719_v27, %v380_v62 }
 0x19d   :  { %v618_v24 = vmin.u32 %v224_v13, %v881_v8  ;;  %v392_v32 = vshll.u32 %v720_v29, %v380_v62  ;;  %v393_v6 = vshrl.u32 %v721_v31, %v381_v2  ;;  %v396_v7 = vshrl.u32 %v722_v38, %v381_v2 }
 0x19e   :  { %v908_v34 = vshrl.u32 %v323_v26, 30  ;;  %v385_v35 = vor.u32 %v384_v15, %v383_v20  ;;  %v388_v36 = vor.u32 %v387_v16, %v386_v28  ;;  %v391_v37 = vor.u32 %v390_v22, %v389_v30 }
 0x19f   :  { %v226_v33 = vclz %v618_v24  ;;  %v394_v39 = vor.u32 %v393_v6, %v392_v32  ;;  %v395_v40 = vshll.u32 %v721_v31, %v380_v62  ;;  %v474_v41 = vshrl.u32 %v473_v11, 23 }
 0x1a0   :  { %v247_v43 = vsel %vm875_vm15, 0, %v245_v18  ;;  %v325_v44 = vshll.u32 %v908_v34, 30  ;;  %vm401_vm2 = vcmp.lt.s32.totalorder %v896_v17, 4  ;;  %v382_v45 = vshrl.u32 %v717_v23, %v381_v2 }
 0x1a1   :  { %v619_v42 = vadd.s32 4294967294, %v226_v33  ;;  %v397_v46 = vor.u32 %v396_v7, %v395_v40  ;;  %vm398_vm3 = vcmp.lt.s32.totalorder %v896_v17, 1  ;;  %v407_v47 = vsel %vm401_vm2, %v394_v39, 920167782 }
 0x1a2   :  { %v919_v48 = vsub.s32 %v322_v14, %v325_v44  ;;  %vm400_vm5 = vcmp.lt.s32.totalorder %v896_v17, 3  ;;  %v406_v50 = vsel %vm398_vm3, %v385_v35, %v388_v36  ;;  %vm399_vm6 = vcmp.lt.s32.totalorder %v896_v17, 2 }
 0x1a3   :  { %vm620_vm4 = vcmp.lt.s32.totalorder %v619_v42, 0  ;;  %v403_v52 = vsel %vm401_vm2, %v391_v37, 2102212464  ;;  %v408_v53 = vsel %vm400_vm5, %v391_v37, %v407_v47  ;;  %v410_v62 = vsel %vm398_vm3, %v388_v36, %v391_v37 }
 0x1a4   :  { %v229_v51 = vsel %vm620_vm4, 0, %v619_v42  ;;  %v328_v60 = vsub.s32 0, %v919_v48  ;;  %v402_v61 = vsel %vm398_vm3, %v382_v45, %v385_v35  ;;  %v409_v2 = vsel %vm399_vm6, %v406_v50, %v408_v53 }
 0x1a5   :  { %v230_v56 = vsub.s32 32, %v229_v51  ;;  %v234_v59 = vsub.s32 4294967266, %v229_v51  ;;  %v231_v0 = vshll.u32 %v881_v8, %v229_v51  ;;  %v411_v21 = vsel %vm401_vm2, %v397_v46, 1326507024 }
 0x1a6   :  { %v622_v11 = vmin.u32 %v328_v60, %v919_v48  ;;  %v412_v13 = vsel %vm400_vm5, %v394_v39, %v411_v21  ;;  %v404_v14 = vsel %vm400_vm5, %v388_v36, %v403_v52  ;;  %v629_v24 = vadd.s32 4294967169, %v474_v41 }
 0x1a7   :  { %v232_v9 = vshrl.u32 %v214_v19, %v230_v56  ;;  %v235_v54 = vadd.s32 127, %v234_v59  ;;  %v413_v8 = vsel %vm399_vm6, %v410_v62, %v412_v13  ;;  %v951_v32 = vand.u32 8388607, %v470_v58 }
 0x1a8   :  { %v941_v15 = vmul.u32.u64.low %v887_v10, %v409_v2  ;;  %v942_v16 = vmul.u32.u64.high %v887_v10, %v409_v2, %v941_v15  ;;  %v330_v19 = vclz %v622_v11  ;;  %v480_v6 = vadd.s32 1, %v629_v24 }
 0x1a9   :  { %v233_v20 = vor.u32 %v232_v9, %v231_v0  ;;  %v236_v22 = vshll.u32 %v235_v54, 23  ;;  %v946_v18 = vmul.u32.u64.low %v887_v10, %v413_v8  ;;  %v947_v26 = vmul.u32.u64.high %v887_v10, %v413_v8, %v946_v18 }
 0x1aa   :  { %v623_v30 = vadd.s32 4294967294, %v330_v19  ;;  %v251_v7 = vadd.s32 3, %v247_v43  ;;  %v318_v33 = vadd.s32 %v859_v49, %v865_v55  ;;  %v405_v35 = vsel %vm399_vm6, %v402_v61, %v404_v14 }
 0x1ab   :  { %v237_v28 = vor.u32 4788187, %v236_v22  ;;  %v424_v36 = vadd.s32 1, %v942_v16  ;;  %v240_v39 = vcvt.s32.f32 %v233_v20  ;;  %vm481_vm8 = vcmp.gt.s32.totalorder %v480_v6, 0 }
 0x1ac   :  { %vm624_vm7 = vcmp.lt.s32.totalorder %v623_v30, 0  ;;  %v348_v41 = vsub.s32 4, %v908_v34  ;;  %vm423_vm9 = vc.u32 %v947_v26, %v941_v15  ;;  %v482_v42 = vsel %vm481_vm8, %v480_v6, 0 }
 0x1ad   :  { %v238_v37 = vand.u32 2147483647, %v237_v28  ;;  %v333_v40 = vsel %vm624_vm7, 0, %v623_v30  ;;  %v421_v49 = vmul.u32 %v887_v10, %v405_v35  ;;  %vm264_vm10 = vcmp.lt.s32.totalorder %v791_v63, 0 }
 0x1ae   :  { %v334_v44 = vsub.s32 32, %v333_v40  ;;  %v338_v45 = vsub.s32 4294967266, %v333_v40  ;;  %v335_v55 = vshll.u32 %v919_v48, %v333_v40  ;;  %v425_v17 = vsel %vm423_vm9, %v424_v36, %v942_v16 }
 0x1af   :  { %v241_v43 = vmul.f32 %v240_v39, %v238_v37  ;;  %v484_v46 = vand.u32 31, %v482_v42  ;;  %vm967_vm11 = vcmp.le.f32.partialorder %v262_v1, 0.7853982  ;;  %v426_v53 = vadd.s32 %v425_v17, %v421_v49 }
 0x1b0   :  { %v336_v51 = vshrl.u32 %v318_v33, %v334_v44  ;;  %v339_v52 = vadd.s32 127, %v338_v45  ;;  %v971_v56 = vand.u32 3, %v251_v7  ;;  %v976_v10 = vsel %vm264_vm10, %v348_v41, %v908_v34 }
 0x1b1   :  { %v242_v47 = vxor.u32 2147483648, %v241_v43  ;;  %v478_v48 = vor.u32 8388608, %v951_v32  ;;  %v485_v59 = vsub.s32 32, %v484_v46  ;;  %v427_v0 = vadd.s32 536870912, %v426_v53 }
 0x1b2   :  { %v337_v1 = vor.u32 %v336_v51, %v335_v55  ;;  %v340_v62 = vshll.u32 %v339_v52, 23  ;;  %v483_v2 = vshrl.u32 %v482_v42, 5  ;;  %v487_v21 = vshll.u32 %v717_v23, %v484_v46 }
 0x1b3   :  { %v243_v60 = vsel %vm160_vm0, %v242_v47, %v241_v43  ;;  %v488_v9 = vshrl.u32 %v718_v25, %v485_v59  ;;  %v986_v54 = vshrl.u32 %v427_v0, 30  ;;  %v491_v11 = vshrl.u32 %v719_v27, %v485_v59 }
 0x1b4   :  { %v246_v61 = vsel %vm875_vm15, %v784_v57, %v243_v60  ;;  %v341_v34 = vor.u32 4788187, %v340_v62  ;;  %v490_v13 = vshll.u32 %v718_v25, %v484_v46  ;;  %v493_v14 = vshll.u32 %v719_v27, %v484_v46 }
 0x1b5   :  { %672 = vcosq.f32 %v246_v61  ;;  %v494_v8 = vshrl.u32 %v720_v29, %v485_v59  ;;  %v344_v16 = vcvt.s32.f32 %v337_v1  ;;  %v429_v20 = vshll.u32 %v986_v54, 30 }
 0x1b6   :  { %674 = vsinq.f32 %v246_v61  ;;  %v342_v5 = vand.u32 2147483647, %v341_v34  ;;  %v489_v22 = vor.u32 %v488_v9, %v487_v21  ;;  %v496_v19 = vshll.u32 %v720_v29, %v484_v46 }
 0x1b7   :  { %v497_v24 = vshrl.u32 %v721_v31, %v485_v59  ;;  %v499_v18 = vshll.u32 %v721_v31, %v484_v46  ;;  %v500_v28 = vshrl.u32 %v722_v38, %v485_v59  ;;  %v997_v32 = vsub.s32 %v426_v53, %v429_v20  ;;  %v584_v20 = vpop.permute.xlu0 %583 }
 0x1b8   :  { %v345_v30 = vmul.f32 %v344_v16, %v342_v5  ;;  %v492_v25 = vor.u32 %v491_v11, %v490_v13  ;;  %v495_v27 = vor.u32 %v494_v8, %v493_v14  ;;  %v351_v6 = vsel %vm967_vm11, 0, %v976_v10 }
 0x1b9   :  { %v486_v7 = vshrl.u32 %v717_v23, %v485_v59  ;;  %v498_v33 = vor.u32 %v497_v24, %v496_v19  ;;  %v501_v35 = vor.u32 %v500_v28, %v499_v18  ;;  %v432_v36 = vsub.s32 0, %v997_v32 }
 0x1ba   :  { %v346_v29 = vxor.u32 2147483648, %v345_v30  ;;  %vm502_vm12 = vcmp.lt.s32.totalorder %v483_v2, 1  ;;  %v518_v31 = vshll.u32 %v478_v48, 8  ;;  %vm503_vm13 = vcmp.lt.s32.totalorder %v483_v2, 2 }
 0x1bb   :  { %vm504_vm14 = vcmp.lt.s32.totalorder %v483_v2, 3  ;;  %vm505_vm15 = vcmp.lt.s32.totalorder %v483_v2, 4  ;;  %v506_v38 = vsel %vm502_vm12, %v486_v7, %v489_v22  ;;  %v626_v39 = vmin.u32 %v432_v36, %v997_v32 }
 0x1bc   :  { %v347_v37 = vsel %vm264_vm10, %v346_v29, %v345_v30  ;;  %v507_v40 = vsel %vm505_vm15, %v495_v27, 2102212464  ;;  %v510_v41 = vsel %vm502_vm12, %v489_v22, %v492_v25  ;;  %v511_v42 = vsel %vm505_vm15, %v498_v33, 920167782 }
 0x1bd   :  { %v350_v23 = vsel %vm967_vm11, %v791_v63, %v347_v37  ;;  %v514_v43 = vsel %vm502_vm12, %v492_v25, %v495_v27  ;;  %v515_v44 = vsel %vm505_vm15, %v501_v35, 1326507024  ;;  %vm574_vm0 = vcmask 293888  }
 0x1be   :  { %676 = vcosq.f32 %v350_v23  ;;  %v434_v45 = vclz %v626_v39  ;;  %v508_v49 = vsel %vm504_vm14, %v492_v25, %v507_v40  ;;  %v512_v55 = vsel %vm504_vm14, %v495_v27, %v511_v42  ;;  %v586_v40 = vpop.permute.xlu1 %585 }
 0x1bf   :  { %vm595_vm1 = vcmask 318752   ;;  %678 = vsinq.f32 %v350_v23  ;;  %v513_v17 = vsel %vm503_vm13, %v510_v41, %v512_v55  ;;  %v516_v46 = vsel %vm504_vm14, %v498_v33, %v515_v44 }
 0x1c0   :  { %vm250_vm2 = vweird.f32 %v784_v57  ;;  %v627_v47 = vadd.s32 4294967294, %v434_v45  ;;  %v517_v50 = vsel %vm503_vm13, %v514_v43, %v516_v46  ;;  %v355_v10 = vadd.s32 3, %v351_v6 }
 0x1c1   :  { %v1016_v51 = vmul.u32.u64.low %v518_v31, %v513_v17  ;;  %v1017_v52 = vmul.u32.u64.high %v518_v31, %v513_v17, %v1016_v51  ;;  %v509_v48 = vsel %vm503_vm13, %v506_v38, %v508_v49  ;;  %vm253_vm4 = vcmp.lt.s32.totalorder %v971_v56, 2 }
 0x1c2   :  { %v673_v53 = vpop.eup %672  ;;  %v1021_v59 = vmul.u32.u64.low %v518_v31, %v517_v50  ;;  %v1022_v60 = vmul.u32.u64.high %v518_v31, %v517_v50, %v1021_v59  ;;  %vm628_vm3 = vcmp.lt.s32.totalorder %v627_v47, 0  ;;  %vm254_vm5 = vcmp.eq.s32.totalorder %v971_v56, 0 }
 0x1c3   :  { %v675_v1 = vpop.eup %674  ;;  %v258_v62 = vxor.u32 2147483648, %v673_v53  ;;  %v422_v0 = vadd.s32 %v941_v15, %v947_v26  ;;  %v437_v61 = vsel %vm628_vm3, 0, %v627_v47  ;;  %vm257_vm6 = vcmp.eq.s32.totalorder %v971_v56, 2 }
 0x1c4   :  { %v255_v21 = vxor.u32 2147483648, %v675_v1  ;;  %v438_v9 = vsub.s32 32, %v437_v61  ;;  %v442_v2 = vsub.s32 4294967266, %v437_v61  ;;  %v525_v34 = vmul.u32 %v518_v31, %v509_v48 }
 0x1c5   :  { %v528_v11 = vadd.s32 1, %v1017_v52  ;;  %v439_v13 = vshll.u32 %v997_v32, %v437_v61  ;;  %vm527_vm7 = vc.u32 %v1022_v60, %v1016_v51  ;;  %v259_v8 = vsel %vm257_vm6, %v258_v62, %v675_v1 }
 0x1c6   :  { %v256_v14 = vsel %vm254_vm5, %v673_v53, %v255_v21  ;;  %v440_v5 = vshrl.u32 %v422_v0, %v438_v9  ;;  %v443_v16 = vadd.s32 127, %v442_v2  ;;  %v356_v28 = vand.u32 3, %v355_v10 }
 0x1c7   :  { %v529_v15 = vsel %vm527_vm7, %v528_v11, %v1017_v52  ;;  %v260_v26 = vsel %vm253_vm4, %v256_v14, %v259_v8  ;;  %vm354_vm11 = vweird.f32 %v791_v63  ;;  %vm368_vm12 = vcmp.lt.s32.totalorder %v796_v3, 0  ;;  %v588_v14 = vpop.permute.xlu0 %587 }
 0x1c8   :  { %v530_v22 = vadd.s32 %v529_v15, %v525_v34  ;;  %v261_v19 = vsel %vm250_vm2, nan, %v260_v26  ;;  %v441_v24 = vor.u32 %v440_v5, %v439_v13  ;;  %v444_v18 = vshll.u32 %v443_v16, 23 }
 0x1c9   :  { %575 = vst.msk [vmem:[#allocation2] sm:$0xff] %vm574_vm0, %v261_v19  ;;  %vm361_vm8 = vcmp.eq.s32.totalorder %v356_v28, 2  ;;  %vm358_vm9 = vcmp.eq.s32.totalorder %v356_v28, 0  ;;  %vm357_vm10 = vcmp.lt.s32.totalorder %v356_v28, 2  ;;  %v452_v41 = vsub.s32 4, %v986_v54 }
 0x1ca   :  { %v531_v30 = vadd.s32 536870912, %v530_v22  ;;  %596 = vst.msk [vmem:[#allocation2] sm:$0xff] %vm595_vm1, %v584_v20  ;;  %v445_v32 = vor.u32 4788187, %v444_v18  ;;  %v448_v7 = vcvt.s32.f32 %v441_v24  ;;  %vm367_vm13 = vcmp.le.f32.partialorder %v366_v12, 0.7853982 }
 0x1cb   :  { %v677_v25 = vpop.eup %676  ;;  %v453_v63 = vsel %vm368_vm12, %v452_v41, %v986_v54  ;;  %v526_v12 = vadd.s32 %v1016_v51, %v1022_v60  ;;  %vm458_vm4 = vweird.f32 %v796_v3  ;;  %vm472_vm5 = vcmp.lt.s32.totalorder %v871_v4, 0 }
 0x1cc   :  { %v1040_v27 = vshrl.u32 %v531_v30, 30  ;;  %v679_v6 = vpop.eup %678  ;;  %v446_v56 = vand.u32 2147483647, %v445_v32  ;;  %v362_v33 = vxor.u32 2147483648, %v677_v25  ;;  %v455_v17 = vsel %vm367_vm13, 0, %v453_v63 }
 0x1cd   :  { %v359_v57 = vxor.u32 2147483648, %v679_v6  ;;  %v459_v47 = vadd.s32 3, %v455_v17  ;;  %vm471_vm6 = vcmp.le.f32.partialorder %v470_v58, 0.7853982 }
 0x1ce   :  { %v533_v35 = vshll.u32 %v1040_v27, 30  ;;  %v449_v29 = vmul.f32 %v448_v7, %v446_v56  ;;  %v363_v36 = vsel %vm361_vm8, %v362_v33, %v679_v6  ;;  %v556_v16 = vsub.s32 4, %v1040_v27  ;;  %v590_v6 = vpop.permute.xlu1 %589 }
 0x1cf   :  { %v360_v38 = vsel %vm358_vm9, %v677_v25, %v359_v57  ;;  %v460_v59 = vand.u32 3, %v459_v47 }
 0x1d0   :  { %v534_v31 = vsub.s32 %v530_v22, %v533_v35  ;;  %v450_v37 = vxor.u32 2147483648, %v449_v29  ;;  %v364_v39 = vsel %vm357_vm10, %v360_v38, %v363_v36  ;;  %vm562_vm10 = vweird.f32 %v871_v4 }
 0x1d1   :  { %v365_v42 = vsel %vm354_vm11, nan, %v364_v39  ;;  %vm465_vm15 = vcmp.eq.s32.totalorder %v460_v59, 2  ;;  %vm462_vm2 = vcmp.eq.s32.totalorder %v460_v59, 0  ;;  %vm461_vm3 = vcmp.lt.s32.totalorder %v460_v59, 2 }
 0x1d2   :  { %v536_v23 = vsub.s32 0, %v534_v31  ;;  %v451_v43 = vsel %vm368_vm12, %v450_v37, %v449_v29  ;;  %576 = vst.msk [vmem:[#allocation2 + $0x8] sm:$0xff] %vm574_vm0, %v365_v42 }
 0x1d3   :  { %v454_v44 = vsel %vm367_vm13, %v796_v3, %v451_v43  ;;  %597 = vst.msk [vmem:[#allocation2 + $0x8] sm:$0xff] %vm595_vm1, %v586_v40  ;;  %v557_v3 = vsel %vm472_vm5, %v556_v16, %v1040_v27 }
 0x1d4   :  { %v630_v45 = vmin.u32 %v536_v23, %v534_v31  ;;  %680 = vcosq.f32 %v454_v44  ;;  %v559_v20 = vsel %vm471_vm6, 0, %v557_v3 }
 0x1d5   :  { %682 = vsinq.f32 %v454_v44  ;;  %v563_v22 = vadd.s32 3, %v559_v20 }
 0x1d6   :  { %v538_v49 = vclz %v630_v45 }
 0x1d7   :  { %v564_v19 = vand.u32 3, %v563_v22 }
 0x1d8   :  { %v631_v55 = vadd.s32 4294967294, %v538_v49 }
 0x1d9   :  { %vm569_vm7 = vcmp.eq.s32.totalorder %v564_v19, 2  ;;  %vm566_vm8 = vcmp.eq.s32.totalorder %v564_v19, 0  ;;  %vm565_vm9 = vcmp.lt.s32.totalorder %v564_v19, 2 }
 0x1da   :  { %vm632_vm14 = vcmp.lt.s32.totalorder %v631_v55, 0 }
 0x1db   :  { %v541_v46 = vsel %vm632_vm14, 0, %v631_v55 }
 0x1dc   :  { %v542_v50 = vsub.s32 32, %v541_v46  ;;  %v546_v52 = vsub.s32 4294967266, %v541_v46  ;;  %v543_v53 = vshll.u32 %v534_v31, %v541_v46 }
 0x1de   :  { %v544_v10 = vshrl.u32 %v526_v12, %v542_v50  ;;  %v547_v48 = vadd.s32 127, %v546_v52 }
 0x1e0   :  { %v545_v1 = vor.u32 %v544_v10, %v543_v53  ;;  %v548_v62 = vshll.u32 %v547_v48, 23 }
 0x1e1   :  { %v681_v0 = vpop.eup %680 }
 0x1e2   :  { %v549_v54 = vor.u32 4788187, %v548_v62  ;;  %v683_v61 = vpop.eup %682  ;;  %v466_v21 = vxor.u32 2147483648, %v681_v0  ;;  %v552_v2 = vcvt.s32.f32 %v545_v1 }
 0x1e3   :  { %v463_v34 = vxor.u32 2147483648, %v683_v61 }
 0x1e4   :  { %v550_v9 = vand.u32 2147483647, %v549_v54  ;;  %v467_v11 = vsel %vm465_vm15, %v466_v21, %v683_v61 }
 0x1e5   :  { %v464_v51 = vsel %vm462_vm2, %v681_v0, %v463_v34 }
 0x1e6   :  { %v553_v13 = vmul.f32 %v552_v2, %v550_v9  ;;  %v468_v60 = vsel %vm461_vm3, %v464_v51, %v467_v11 }
 0x1e7   :  { %v469_v5 = vsel %vm458_vm4, nan, %v468_v60 }
 0x1e8   :  { %v554_v8 = vxor.u32 2147483648, %v553_v13  ;;  %577 = vst.msk [vmem:[#allocation2 + $0x10] sm:$0xff] %vm574_vm0, %v469_v5 }
 0x1e9   :  { %598 = vst.msk [vmem:[#allocation2 + $0x10] sm:$0xff] %vm595_vm1, %v588_v14 }
 0x1ea   :  { %v555_v15 = vsel %vm472_vm5, %v554_v8, %v553_v13 }
 0x1eb   :  { %v558_v26 = vsel %vm471_vm6, %v871_v4, %v555_v15 }
 0x1ec   :  { %684 = vcosq.f32 %v558_v26 }
 0x1ed   :  { %686 = vsinq.f32 %v558_v26 }
 0x1f9   :  { %v685_v24 = vpop.eup %684 }
 0x1fa   :  { %v687_v18 = vpop.eup %686  ;;  %v570_v28 = vxor.u32 2147483648, %v685_v24 }
 0x1fb   :  { %v567_v30 = vxor.u32 2147483648, %v687_v18 }
 0x1fc   :  { %v571_v32 = vsel %vm569_vm7, %v570_v28, %v687_v18 }
 0x1fd   :  { %v568_v58 = vsel %vm566_vm8, %v685_v24, %v567_v30 }
 0x1fe   :  { %v572_v25 = vsel %vm565_vm9, %v568_v58, %v571_v32 }
 0x1ff   :  { %v573_v27 = vsel %vm562_vm10, nan, %v572_v25 }
 0x200   :  { %578 = vst.msk [vmem:[#allocation2 + $0x18] sm:$0xff] %vm574_vm0, %v573_v27 }
 0x201   :  { %599 = vst.msk [vmem:[#allocation2 + $0x18] sm:$0xff] %vm595_vm1, %v590_v6 }
 0x202   :  { %699 = shalt.err (!%p696_p4)
}
 0x203   :  { %s724_s24 = smov 128   ;;  %s725_s25 = smov 8  }
 0x204   :  { %611 = dma.vmem_to_hbm [thread:$0]  %s606_s22, 512, %s1071_s2, [#allocation3], %s724_s24, %s724_s24, %s725_s25  }
 0x205   :  { %708 = dma.done.wait [#allocation3], 512  }
 0x206   :  { %709 = vsyncadd [#allocation3], 4294966784 }
 0x207   :  { %615 = vsyncpa [#allocation3], 1 }

</bundles_post_ra>
